<compile_context>
chip_gen: v5e
topology: v5e:2x2
jax: 0.10.0
libtpu: 0.0.40
codegen_flags: <defaults>
</compile_context>

<pallas_src>
import jax
import jax.numpy as jnp
from jax.experimental import pallas as pl
from jax.experimental.pallas import tpu as pltpu

_LANE = 128
_SMALL_BYTES = 256 << 10   # below this: single full-dim block (split not worth it)
_BLOCK_BYTES = 4 << 20     # ~4 MiB per block buffer (v7x-friendly tile size)
_VMEM_LIMIT = 32 << 20     # 2 arrays x 2 buffers x 4 MiB = 16 MiB + headroom


def _cdiv(a, b):
    return -(-a // b)


def _round_up(a, b):
    return _cdiv(a, b) * b


def _prelu_kernel(alpha_ref, x_ref, o_ref):
    # alpha_ref: (1,) f32 scalar in SMEM holding the PReLU slope (1 - relu_alpha)
    a = alpha_ref[0].astype(o_ref.dtype)
    x = x_ref[...]
    o_ref[...] = jnp.where(x >= 0, x, a * x)


def _prelu_2d(x2d, slope):
    """Run the PReLU kernel over a lane-dense (rows, 128) slab."""
    rows = x2d.shape[0]
    itemsize = jnp.dtype(x2d.dtype).itemsize
    # dtype-aware sublane granularity (f32:8, bf16:16, int8/fp8:32)
    sub = {4: 8, 2: 16, 1: 32}.get(itemsize, 8)
    total_bytes = rows * _LANE * itemsize

    if total_bytes <= _SMALL_BYTES:
        # Tiny input: one full-dim block (always a legal block shape).
        tile_rows = rows
    else:
        tile_rows_target = max(sub, _BLOCK_BYTES // (_LANE * itemsize))
        # Even number of roughly equal blocks -> both v7x TCs busy and balanced;
        # harmless on single-TC v5e/v6e.
        nblk = 2 * _cdiv(rows, 2 * tile_rows_target)
        tile_rows = min(rows, _round_up(_cdiv(rows, nblk), sub))
    grid = (_cdiv(rows, tile_rows),)

    return pl.pallas_call(
        _prelu_kernel,
        out_shape=jax.ShapeDtypeStruct((rows, _LANE), x2d.dtype),
        grid_spec=pltpu.PrefetchScalarGridSpec(
            num_scalar_prefetch=0,
            grid=grid,
            in_specs=[
                pl.BlockSpec(memory_space=pltpu.SMEM),               # slope (f32)
                pl.BlockSpec((tile_rows, _LANE), lambda i: (i, 0)),  # x tile
            ],
            out_specs=pl.BlockSpec((tile_rows, _LANE), lambda i: (i, 0)),
        ),
        compiler_params=pltpu.CompilerParams(
            dimension_semantics=("parallel",),
            vmem_limit_bytes=_VMEM_LIMIT,
        ),
        input_output_aliases={1: 0},   # x slab -> output (donor-friendly)
        cost_estimate=pl.CostEstimate(
            flops=rows * _LANE,
            transcendentals=0,
            bytes_accessed=2 * rows * _LANE * itemsize),
    )(slope, x2d)


def remrelu_forward(x, relu_alpha):
    """Pallas implementation of remrelu.forward (single-weight PReLU).

    x          : jnp array, any shape (NCHW expected), float dtype.
    relu_alpha : python float / scalar array, the module's relu_alpha parameter.
    """
    slope = (1.0 - jnp.asarray(relu_alpha, dtype=jnp.float32)).reshape(1)

    orig_shape = x.shape
    n = x.size
    if n == 0:
        return x

    flat = x.reshape(-1)
    n_main = (n // _LANE) * _LANE
    tail_n = n - n_main

    if tail_n == 0:
        out2d = _prelu_2d(flat.reshape(n_main // _LANE, _LANE), slope)
        return out2d.reshape(orig_shape)

    # Ragged: kernel on the aligned prefix; the <128-element tail is a handful
    # of bytes -> plain jnp.where (no pad/strip round trip over the tensor).
    a = slope[0].astype(x.dtype)
    tail = flat[n_main:]
    tail_out = jnp.where(tail >= 0, tail, a * tail)
    if n_main == 0:
        return tail_out.reshape(orig_shape)
    main_out = _prelu_2d(flat[:n_main].reshape(n_main // _LANE, _LANE), slope)
    return jnp.concatenate([main_out.reshape(-1), tail_out]).reshape(orig_shape)


def _ref(x, relu_alpha):
    a = jnp.asarray(1.0 - relu_alpha, dtype=jnp.float32).astype(x.dtype)
    return jnp.where(x >= 0, x, a * x)


if __name__ == "__main__":
    key = jax.random.PRNGKey(0)
    k0, k1, k2, k3 = jax.random.split(key, 4)

    # Primary test: NCHW input matching the module's expected layout.
    # Module __init__: relu_alpha = 1.0  =>  PReLU slope = 1 - 1.0 = 0.0 (== ReLU)
    x = jax.random.normal(k0, (2, 4, 16, 16), dtype=jnp.float32)
    relu_alpha = 1.0
    y = jax.block_until_ready(remrelu_forward(x, relu_alpha))
    assert y.shape == x.shape and y.dtype == x.dtype
    assert jnp.allclose(y, _ref(x, relu_alpha), atol=1e-6), "mismatch (primary)"

    # Non-trivial slope + ragged element count (exercises the tail path).
    x_r = jax.random.normal(k1, (3, 5, 7, 11), dtype=jnp.float32)
    y_r = jax.block_until_ready(remrelu_forward(x_r, 0.7))
    assert jnp.allclose(y_r, _ref(x_r, 0.7), atol=1e-6), "mismatch (ragged)"

    # bf16 input (dtype-aware tiling + slope cast at use).
    x_b = jax.random.normal(k2, (2, 4, 16, 16), dtype=jnp.bfloat16)
    y_b = jax.block_until_ready(remrelu_forward(x_b, 0.25))
    assert y_b.dtype == jnp.bfloat16
    assert jnp.allclose(y_b.astype(jnp.float32),
                        _ref(x_b, 0.25).astype(jnp.float32), atol=1e-2), "mismatch (bf16)"

    # ~1 MiB input -> even 2-block grid (balanced megacore path), partial last block.
    x_m = jax.random.normal(k3, (2, 1028, 128), dtype=jnp.float32)
    y_m = jax.block_until_ready(remrelu_forward(x_m, 0.5))
    assert jnp.allclose(y_m, _ref(x_m, 0.5), atol=1e-6), "mismatch (multi-tile)"

    print("KERNEL_OK")
</pallas_src>

<mosaic_0001>
module attributes {stable_mosaic.version = 11 : i64} {
  func.func @_prelu_kernel(%arg0: i32, %arg1: memref<1xf32, #tpu.memory_space<smem>>, %arg2: memref<16x128xf32, #tpu.memory_space<vmem>>, %arg3: memref<16x128xf32, #tpu.memory_space<vmem>>) attributes {dimension_semantics = [#tpu.dimension_semantics<parallel>], iteration_bounds = array<i64: 1>, scalar_prefetch = 0 : i64, scratch_operands = 0 : i64, tpu.core_type = #tpu.core_type<tc>, window_params = [{transform_indices = @transform_0, window_bounds = array<i64: 1>}, {transform_indices = @transform_1, window_bounds = array<i64: 16, 128>}, {transform_indices = @transform_2, window_bounds = array<i64: 16, 128>}]} {
    %c0 = arith.constant 0 : index
    %0 = memref.load %arg1[%c0] : memref<1xf32, #tpu.memory_space<smem>>
    %c0_0 = arith.constant 0 : index
    %c0_1 = arith.constant 0 : index
    %1 = vector.load %arg2[%c0_0, %c0_1] : memref<16x128xf32, #tpu.memory_space<vmem>>, vector<16x128xf32>
    %cst = arith.constant 0.000000e+00 : f32
    %2 = vector.broadcast %cst : f32 to vector<16x128xf32>
    %3 = arith.cmpf oge, %1, %2 : vector<16x128xf32>
    %4 = vector.broadcast %0 : f32 to vector<16x128xf32>
    %5 = arith.mulf %4, %1 : vector<16x128xf32>
    %6 = arith.select %3, %1, %5 : vector<16x128xi1>, vector<16x128xf32>
    %c0_2 = arith.constant 0 : index
    %c0_3 = arith.constant 0 : index
    %7 = vector.load %arg3[%c0_2, %c0_3] : memref<16x128xf32, #tpu.memory_space<vmem>>, vector<16x128xf32>
    tpu.vector_store %arg3[%c0_2, %c0_3], %6 {strides = array<i32>} : memref<16x128xf32, #tpu.memory_space<vmem>>, vector<16x128xf32>,
    return
  }
  func.func @transform_0(%arg0: i32) -> i32 {
    %c0_i32 = arith.constant 0 : i32
    %c0_i32_0 = arith.constant 0 : i32
    return %c0_i32 : i32
  }
  func.func @transform_1(%arg0: i32) -> (i32, i32) {
    %c0_i32 = arith.constant 0 : i32
    %c0_i32_0 = arith.constant 0 : i32
    return %arg0, %c0_i32 : i32, i32
  }
  func.func @transform_2(%arg0: i32) -> (i32, i32) {
    %c0_i32 = arith.constant 0 : i32
    %c0_i32_0 = arith.constant 0 : i32
    return %arg0, %c0_i32 : i32, i32
  }
}

</mosaic_0001>

<bundles_post_ra>
// kernel: tpu_custom_call.1
= control target key start
LH: loop header
LB: loop body
LE: loop exit
PB: predicated region body
PF: predicated region fallthrough
CT: control target
= control target key end

     0   :  { %8 = vsyncpa [#allocation4], 0  ;;  %s144_s0 = inlined_call_operand.<no memory space> [shape: f32[1], index: 0, kind: input, shape index: {}]   ;;  %s145_s1 = inlined_call_operand.hbm [shape: f32[16,128], index: 1, kind: input, shape index: {}, may-alias: {1,2}]   ;;  %s146_s2 = inlined_call_operand.hbm [shape: f32[16,128], index: 2, kind: output, shape index: {}, may-alias: {1,2}]  }
   0x1   :  { %9 = vsyncpa [#allocation5], 0  ;;  %s16_s11 = sshll.u32 %s145_s1, 4  ;;  %s116_s12 = smov [#allocation3]   ;;  %s17_s11 = int_to_ptr.hbm [resolvable:$true] %s16_s11 }
   0x2   :  { %s18_s13 = sshll.u32 %s116_s12, 4  ;;  %s117_s14 = smov 128   ;;  %s19_s13 = int_to_ptr.vmem [resolvable:$true] %s18_s13 }
   0x3   :  { %s118_s15 = smov 8  }
   0x4   :  { %24 = dma.hbm_to_vmem [thread:$0]  %s17_s11, 256, %s19_s13, [#allocation4], %s117_s14, %s117_s14, %s118_s15  }
   0x5   :  { %112 = dma.done.wait [#allocation4], 256  }
   0x6   :  { %113 = vsyncadd [#allocation4], 4294967040  ;;  %v34_v0 = vstv %s144_s0  ;;  %v30_v1 = vld [vmem:[#allocation3] sm:$0xff]  ;;  %v31_v2 = vld [vmem:[#allocation3 + $0x8] sm:$0xff]  ;;  %s119_s18 = smov [#allocation6]   ;;  %s47_s1 = sshll.u32 %s146_s2, 4  ;;  %s48_s1 = int_to_ptr.hbm [resolvable:$true] %s47_s1 }
   0x7   :  { %s45_s19 = sshll.u32 %s119_s18, 4  ;;  %vm32_vm0 = vcmp.ge.f32.partialorder %v30_v1, 0.0  ;;  %v35_v3 = vmul.f32 %v34_v0, %v30_v1  ;;  %vm33_vm1 = vcmp.ge.f32.partialorder %v31_v2, 0.0  ;;  %v36_v4 = vmul.f32 %v34_v0, %v31_v2  ;;  %s46_s19 = int_to_ptr.vmem [resolvable:$true] %s45_s19 }
   0x9   :  { %v37_v5 = vsel %vm32_vm0, %v30_v1, %v35_v3  ;;  %v38_v6 = vsel %vm33_vm1, %v31_v2, %v36_v4 }
   0xa   :  { %39 = vst [vmem:[#allocation6] sm:$0xff] %v37_v5 }
   0xb   :  { %40 = vst [vmem:[#allocation6 + $0x8] sm:$0xff] %v38_v6 }
   0xc   :  { %53 = dma.vmem_to_hbm [thread:$0]  %s46_s19, 256, %s48_s1, [#allocation5], %s117_s14, %s117_s14, %s118_s15  }
   0xd   :  { %114 = dma.done.wait [#allocation5], 256  }
   0xe   :  { %115 = vsyncadd [#allocation5], 4294967040 }
   0xf   :  { %58 = vsyncpa [#allocation4], 1 }
  0x10   :  { %59 = vsyncpa [#allocation5], 1 }

</bundles_post_ra>
